<compile_context>
chip_gen: v6e
topology: v6e:2x2x1
jax: 0.10.0
libtpu: 0.0.40
codegen_flags: <defaults>
</compile_context>

<pallas_src>
import functools

import jax
import jax.numpy as jnp
from jax.experimental import pallas as pl
from jax.experimental.pallas import tpu as pltpu


LANE = 128
SUBLANE = 8


def _round_up(x, m):
    return (x + m - 1) // m * m


def nli_classifier_kernel(ph_ref,
                          w0_ref, b0_ref,
                          w1_ref, b1_ref,
                          wc_ref, bc_ref,
                          out_ref, *, sentence_dim):
    ph = ph_ref[...]                          # (tile_m, 2*d) f32
    pre = ph[:, :sentence_dim]
    hyp = ph[:, sentence_dim:]

    # Elementwise feature math in f32 (cheap on all chips; v5e has no bf16 VALU).
    diff = jnp.abs(pre - hyp)
    prod = pre * hyp

    mm_dtype = w0_ref.dtype
    # mlp_input = cat([pre, hyp, |pre-hyp|, pre*hyp], dim=1): assembled directly
    # in the matmul dtype (half the concat bytes), one (tile_m, 4d) slab feeding
    # a single K=4d matmul instead of four underfilled K=d matmuls.
    x = jnp.concatenate(
        [pre.astype(mm_dtype), hyp.astype(mm_dtype),
         diff.astype(mm_dtype), prod.astype(mm_dtype)], axis=1)

    # MLP layer 1: Linear + ReLU (+ Dropout as eval-mode identity).
    h = jnp.dot(x, w0_ref[...], preferred_element_type=jnp.float32) + b0_ref[...]
    h = jnp.maximum(h, 0.0)
    # TODO(synk): train-mode dropout would use pltpu.prng_seed / pltpu.stateful_bernoulli.

    # MLP layer 2: Linear + ReLU (+ Dropout identity).
    h = jnp.dot(h.astype(mm_dtype), w1_ref[...],
                preferred_element_type=jnp.float32) + b1_ref[...]
    h = jnp.maximum(h, 0.0)

    # Classifier head: lane-dense (tile_m, 128) matmul, but only the narrow
    # out_ref (first round_up(C, 8) lanes) is written back to HBM.
    logits = jnp.dot(h.astype(mm_dtype), wc_ref[...],
                     preferred_element_type=jnp.float32) + bc_ref[...]
    out_ref[...] = logits[:, :out_ref.shape[1]].astype(out_ref.dtype)


def nli_classifier_forward(pre, hyp, params, *,
                           matmul_dtype=jnp.bfloat16, tile_m=2048):
    """pre, hyp: (B, sentence_dim) float32. Returns (B, num_classes) float32."""
    w0, b0, w1, b1, wc, bc = params          # (in, out) layout
    B, d = pre.shape
    k0 = 4 * d
    H = w0.shape[1]
    C = wc.shape[1]
    assert w0.shape == (k0, H) and w1.shape == (H, H) and wc.shape == (H, C)

    H_pad = _round_up(H, LANE)        # keep at 128; do NOT pad to 256 for v7x MXU
    C_pad = _round_up(C, LANE)        # lane-dense head matmul inside the kernel
    C_store = _round_up(C, SUBLANE)   # narrow output slab actually written to HBM

    # Zero-pad hidden/class lanes to full 128-lane tiles (numerically exact).
    w0p = jnp.zeros((k0, H_pad), matmul_dtype).at[:, :H].set(w0.astype(matmul_dtype))
    b0p = jnp.zeros((1, H_pad), jnp.float32).at[:, :H].set(b0.reshape(1, H))
    w1p = jnp.zeros((H_pad, H_pad), matmul_dtype).at[:H, :H].set(w1.astype(matmul_dtype))
    b1p = jnp.zeros((1, H_pad), jnp.float32).at[:, :H].set(b1.reshape(1, H))
    wcp = jnp.zeros((H_pad, C_pad), matmul_dtype).at[:H, :C].set(wc.astype(matmul_dtype))
    bcp = jnp.zeros((1, C_pad), jnp.float32).at[:, :C].set(bc.reshape(1, C))

    # Single merged activation stream: one (B, 2d) slab instead of two (B, d).
    ph = jnp.concatenate([pre, hyp], axis=1)

    # Batch tiling: big tiles amortize per-step pipeline overhead, but keep at
    # least 2 grid steps whenever the batch allows so v7x's two TensorCores
    # both get work under dimension_semantics=("parallel",).
    tile_m = _round_up(max(SUBLANE, tile_m), SUBLANE)
    b_rounded = _round_up(B, SUBLANE)
    if b_rounded >= 2 * SUBLANE:
        tile_m = min(tile_m, _round_up((b_rounded + 1) // 2, SUBLANE))
    tile_m = min(tile_m, b_rounded)
    B_pad = _round_up(B, tile_m)
    if B_pad != B:
        ph = jnp.zeros((B_pad, 2 * d), ph.dtype).at[:B].set(ph)

    grid = (B_pad // tile_m,)

    def resident(arr):
        # Weights / biases: whole array, constant index_map -> VMEM-resident.
        return pl.BlockSpec(arr.shape, lambda i: (0, 0))

    kernel = functools.partial(nli_classifier_kernel, sentence_dim=d)

    out_padded = pl.pallas_call(
        kernel,
        out_shape=jax.ShapeDtypeStruct((B_pad, C_store), jnp.float32),
        grid=grid,
        in_specs=[
            pl.BlockSpec((tile_m, 2 * d), lambda i: (i, 0)),
            resident(w0p), resident(b0p),
            resident(w1p), resident(b1p),
            resident(wcp), resident(bcp),
        ],
        out_specs=pl.BlockSpec((tile_m, C_store), lambda i: (i, 0)),
        compiler_params=pltpu.CompilerParams(
            dimension_semantics=("parallel",),
            vmem_limit_bytes=32 * 1024 * 1024),
    )(ph, w0p, b0p, w1p, b1p, wcp, bcp)

    return out_padded[:B, :C]


def reference_forward(pre, hyp, params):
    w0, b0, w1, b1, wc, bc = params
    x = jnp.concatenate([pre, hyp, jnp.abs(pre - hyp), pre * hyp], axis=1)
    h = jnp.maximum(x @ w0 + b0, 0.0)
    h = jnp.maximum(h @ w1 + b1, 0.0)
    return h @ wc + bc


def init_params(key, sentence_dim, hidden_dim, num_classes):
    ks = jax.random.split(key, 6)
    scale = 0.05
    w0 = scale * jax.random.normal(ks[0], (4 * sentence_dim, hidden_dim), jnp.float32)
    b0 = scale * jax.random.normal(ks[1], (1, hidden_dim), jnp.float32)
    w1 = scale * jax.random.normal(ks[2], (hidden_dim, hidden_dim), jnp.float32)
    b1 = scale * jax.random.normal(ks[3], (1, hidden_dim), jnp.float32)
    wc = scale * jax.random.normal(ks[4], (hidden_dim, num_classes), jnp.float32)
    bc = scale * jax.random.normal(ks[5], (1, num_classes), jnp.float32)
    return (w0, b0, w1, b1, wc, bc)


if __name__ == "__main__":
    batch = 8
    sentence_dim = 32
    hidden_dim = 64
    num_layers = 2  # kernel implements the two Linear+ReLU(+Dropout) blocks
    num_classes = 3

    key = jax.random.PRNGKey(0)
    k_pre, k_hyp, k_params = jax.random.split(key, 3)
    pre = jax.random.normal(k_pre, (batch, sentence_dim), jnp.float32)
    hyp = jax.random.normal(k_hyp, (batch, sentence_dim), jnp.float32)
    params = init_params(k_params, sentence_dim, hidden_dim, num_classes)

    out = nli_classifier_forward(pre, hyp, params)
    jax.block_until_ready(out)

    ref = reference_forward(pre, hyp, params)
    assert out.shape == (batch, num_classes)
    # Matmuls run with bf16 operands (f32 accumulation), so compare loosely.
    assert jnp.allclose(out, ref, atol=3e-2, rtol=3e-2), "mismatch vs reference"

    print("KERNEL_OK")
</pallas_src>

<mosaic_0001>
module attributes {stable_mosaic.version = 11 : i64} {
  func.func @nli_classifier_kernel(%arg0: i32, %arg1: memref<8x64xf32, #tpu.memory_space<vmem>>, %arg2: memref<128x128xbf16, #tpu.memory_space<vmem>>, %arg3: memref<1x128xf32, #tpu.memory_space<vmem>>, %arg4: memref<128x128xbf16, #tpu.memory_space<vmem>>, %arg5: memref<1x128xf32, #tpu.memory_space<vmem>>, %arg6: memref<128x128xbf16, #tpu.memory_space<vmem>>, %arg7: memref<1x128xf32, #tpu.memory_space<vmem>>, %arg8: memref<8x8xf32, #tpu.memory_space<vmem>>) attributes {dimension_semantics = [#tpu.dimension_semantics<parallel>], iteration_bounds = array<i64: 1>, scalar_prefetch = 0 : i64, scratch_operands = 0 : i64, tpu.core_type = #tpu.core_type<tc>, window_params = [{transform_indices = @transform_0, window_bounds = array<i64: 8, 64>}, {pipeline_mode = #tpu.pipeline_mode<synchronous>, transform_indices = @transform_1, window_bounds = array<i64: 128, 128>}, {pipeline_mode = #tpu.pipeline_mode<synchronous>, transform_indices = @transform_2, window_bounds = array<i64: 1, 128>}, {pipeline_mode = #tpu.pipeline_mode<synchronous>, transform_indices = @transform_3, window_bounds = array<i64: 128, 128>}, {pipeline_mode = #tpu.pipeline_mode<synchronous>, transform_indices = @transform_4, window_bounds = array<i64: 1, 128>}, {pipeline_mode = #tpu.pipeline_mode<synchronous>, transform_indices = @transform_5, window_bounds = array<i64: 128, 128>}, {pipeline_mode = #tpu.pipeline_mode<synchronous>, transform_indices = @transform_6, window_bounds = array<i64: 1, 128>}, {transform_indices = @transform_7, window_bounds = array<i64: 8, 8>}]} {
    %c0 = arith.constant 0 : index
    %c0_0 = arith.constant 0 : index
    %0 = vector.load %arg1[%c0, %c0_0] : memref<8x64xf32, #tpu.memory_space<vmem>>, vector<8x64xf32>
    %1 = vector.extract_strided_slice %0 {offsets = [0, 0], sizes = [8, 32], strides = [1, 1]} : vector<8x64xf32> to vector<8x32xf32>
    %2 = vector.extract_strided_slice %0 {offsets = [0, 32], sizes = [8, 32], strides = [1, 1]} : vector<8x64xf32> to vector<8x32xf32>
    %3 = arith.subf %1, %2 : vector<8x32xf32>
    %4 = math.absf %3 : vector<8x32xf32>
    %5 = arith.mulf %1, %2 : vector<8x32xf32>
    %6 = arith.truncf %1 : vector<8x32xf32> to vector<8x32xbf16>
    %7 = arith.truncf %2 : vector<8x32xf32> to vector<8x32xbf16>
    %8 = arith.truncf %4 : vector<8x32xf32> to vector<8x32xbf16>
    %9 = arith.truncf %5 : vector<8x32xf32> to vector<8x32xbf16>
    %10 = tpu.concatenate %6, %7, %8, %9 in 1 : vector<8x32xbf16>, vector<8x32xbf16>, vector<8x32xbf16>, vector<8x32xbf16> -> vector<8x128xbf16>
    %c0_1 = arith.constant 0 : index
    %c0_2 = arith.constant 0 : index
    %11 = vector.load %arg2[%c0_1, %c0_2] : memref<128x128xbf16, #tpu.memory_space<vmem>>, vector<128x128xbf16>
    %cst = arith.constant dense<0.000000e+00> : vector<8x128xf32>
    %12 = tpu.matmul %10, %11, %cst {dimension_numbers = #tpu.dot_dimension_numbers<[1], [0], [0], [1], [0, 0, 1, 1], [], []>} : vector<8x128xbf16>, vector<128x128xbf16>, vector<8x128xf32> -> vector<8x128xf32>
    %c0_3 = arith.constant 0 : index
    %c0_4 = arith.constant 0 : index
    %13 = vector.load %arg3[%c0_3, %c0_4] : memref<1x128xf32, #tpu.memory_space<vmem>>, vector<1x128xf32>
    %14 = vector.broadcast %13 : vector<1x128xf32> to vector<8x128xf32>
    %15 = arith.addf %12, %14 : vector<8x128xf32>
    %cst_5 = arith.constant 0.000000e+00 : f32
    %16 = vector.broadcast %cst_5 : f32 to vector<8x128xf32>
    %17 = arith.maximumf %15, %16 : vector<8x128xf32>
    %18 = arith.truncf %17 : vector<8x128xf32> to vector<8x128xbf16>
    %c0_6 = arith.constant 0 : index
    %c0_7 = arith.constant 0 : index
    %19 = vector.load %arg4[%c0_6, %c0_7] : memref<128x128xbf16, #tpu.memory_space<vmem>>, vector<128x128xbf16>
    %cst_8 = arith.constant dense<0.000000e+00> : vector<8x128xf32>
    %20 = tpu.matmul %18, %19, %cst_8 {dimension_numbers = #tpu.dot_dimension_numbers<[1], [0], [0], [1], [0, 0, 1, 1], [], []>} : vector<8x128xbf16>, vector<128x128xbf16>, vector<8x128xf32> -> vector<8x128xf32>
    %c0_9 = arith.constant 0 : index
    %c0_10 = arith.constant 0 : index
    %21 = vector.load %arg5[%c0_9, %c0_10] : memref<1x128xf32, #tpu.memory_space<vmem>>, vector<1x128xf32>
    %22 = vector.broadcast %21 : vector<1x128xf32> to vector<8x128xf32>
    %23 = arith.addf %20, %22 : vector<8x128xf32>
    %cst_11 = arith.constant 0.000000e+00 : f32
    %24 = vector.broadcast %cst_11 : f32 to vector<8x128xf32>
    %25 = arith.maximumf %23, %24 : vector<8x128xf32>
    %26 = arith.truncf %25 : vector<8x128xf32> to vector<8x128xbf16>
    %c0_12 = arith.constant 0 : index
    %c0_13 = arith.constant 0 : index
    %27 = vector.load %arg6[%c0_12, %c0_13] : memref<128x128xbf16, #tpu.memory_space<vmem>>, vector<128x128xbf16>
    %cst_14 = arith.constant dense<0.000000e+00> : vector<8x128xf32>
    %28 = tpu.matmul %26, %27, %cst_14 {dimension_numbers = #tpu.dot_dimension_numbers<[1], [0], [0], [1], [0, 0, 1, 1], [], []>} : vector<8x128xbf16>, vector<128x128xbf16>, vector<8x128xf32> -> vector<8x128xf32>
    %c0_15 = arith.constant 0 : index
    %c0_16 = arith.constant 0 : index
    %29 = vector.load %arg7[%c0_15, %c0_16] : memref<1x128xf32, #tpu.memory_space<vmem>>, vector<1x128xf32>
    %30 = vector.broadcast %29 : vector<1x128xf32> to vector<8x128xf32>
    %31 = arith.addf %28, %30 : vector<8x128xf32>
    %32 = vector.extract_strided_slice %31 {offsets = [0, 0], sizes = [8, 8], strides = [1, 1]} : vector<8x128xf32> to vector<8x8xf32>
    %c0_17 = arith.constant 0 : index
    %c0_18 = arith.constant 0 : index
    %33 = vector.load %arg8[%c0_17, %c0_18] : memref<8x8xf32, #tpu.memory_space<vmem>>, vector<8x8xf32>
    tpu.vector_store %arg8[%c0_17, %c0_18], %32 {strides = array<i32>} : memref<8x8xf32, #tpu.memory_space<vmem>>, vector<8x8xf32>,
    return
  }
  func.func @transform_0(%arg0: i32) -> (i32, i32) {
    %c0_i32 = arith.constant 0 : i32
    %c0_i32_0 = arith.constant 0 : i32
    return %arg0, %c0_i32 : i32, i32
  }
  func.func @transform_1(%arg0: i32) -> (i32, i32) {
    %c0_i32 = arith.constant 0 : i32
    %c0_i32_0 = arith.constant 0 : i32
    %c0_i32_1 = arith.constant 0 : i32
    return %c0_i32, %c0_i32_0 : i32, i32
  }
  func.func @transform_2(%arg0: i32) -> (i32, i32) {
    %c0_i32 = arith.constant 0 : i32
    %c0_i32_0 = arith.constant 0 : i32
    %c0_i32_1 = arith.constant 0 : i32
    return %c0_i32, %c0_i32_0 : i32, i32
  }
  func.func @transform_3(%arg0: i32) -> (i32, i32) {
    %c0_i32 = arith.constant 0 : i32
    %c0_i32_0 = arith.constant 0 : i32
    %c0_i32_1 = arith.constant 0 : i32
    return %c0_i32, %c0_i32_0 : i32, i32
  }
  func.func @transform_4(%arg0: i32) -> (i32, i32) {
    %c0_i32 = arith.constant 0 : i32
    %c0_i32_0 = arith.constant 0 : i32
    %c0_i32_1 = arith.constant 0 : i32
    return %c0_i32, %c0_i32_0 : i32, i32
  }
  func.func @transform_5(%arg0: i32) -> (i32, i32) {
    %c0_i32 = arith.constant 0 : i32
    %c0_i32_0 = arith.constant 0 : i32
    %c0_i32_1 = arith.constant 0 : i32
    return %c0_i32, %c0_i32_0 : i32, i32
  }
  func.func @transform_6(%arg0: i32) -> (i32, i32) {
    %c0_i32 = arith.constant 0 : i32
    %c0_i32_0 = arith.constant 0 : i32
    %c0_i32_1 = arith.constant 0 : i32
    return %c0_i32, %c0_i32_0 : i32, i32
  }
  func.func @transform_7(%arg0: i32) -> (i32, i32) {
    %c0_i32 = arith.constant 0 : i32
    %c0_i32_0 = arith.constant 0 : i32
    return %arg0, %c0_i32 : i32, i32
  }
}

</mosaic_0001>

<bundles_post_ra>
// kernel: tpu_custom_call.1
= control target key start
LH: loop header
LB: loop body
LE: loop exit
PB: predicated region body
PF: predicated region fallthrough
CT: control target
= control target key end

     0   :  { %12 = vsyncpa [#allocation3], 0  ;;  %s841_s0 = inlined_call_operand.hbm [shape: f32[8,64], index: 0, kind: input, shape index: {}]   ;;  %s842_s1 = inlined_call_operand.hbm [shape: bf16[128,128], index: 1, kind: input, shape index: {}]   ;;  %s843_s2 = inlined_call_operand.vmem [shape: f32[1,128], index: 2, kind: input, shape index: {}]   ;;  %s844_s3 = inlined_call_operand.hbm [shape: bf16[128,128], index: 3, kind: input, shape index: {}]   ;;  %s845_s4 = inlined_call_operand.vmem [shape: f32[1,128], index: 4, kind: input, shape index: {}]   ;;  %s846_s5 = inlined_call_operand.hbm [shape: bf16[128,128], index: 5, kind: input, shape index: {}]   ;;  %s847_s6 = inlined_call_operand.vmem [shape: f32[1,128], index: 6, kind: input, shape index: {}]   ;;  %s848_s7 = inlined_call_operand.hbm [shape: f32[8,8], index: 7, kind: output, shape index: {}]  }
   0x1   :  { %13 = vsyncpa [#allocation6], 0 }
   0x2   :  { %14 = vsyncpa [#allocation9], 0 }
   0x3   :  { %15 = vsyncpa [#allocation4], 0  ;;  %s718_s24 = smov [#allocation5]  }
   0x4   :  { %s31_s25 = sshll.u32 %s718_s24, 4  ;;  %s32_s25 = int_to_ptr.vmem [resolvable:$true] %s31_s25 }
   0x5   :  { %s618_s26 = scalar_lea.vmem %s32_s25, 1024  ;;  %p623_p1 = scmp.lt.s32.totalorder %s32_s25, %s32_s25 }
   0x6   :  { %p619_p0 = scmp.ne.s32.totalorder %s32_s25, %s618_s26  ;;  %p624_p2 = scmp.lt.s32.totalorder %s618_s26, %s618_s26 }
   0x8   :  { %p625_p3 = por %p624_p2, %p623_p1 }
   0xa   :  { %p626_p4 = pnand %p625_p3, %p619_p0 }
   0xc   :  { %629 = shalt.err (!%p626_p4)
}
   0xd   :  { %s719_s27 = smov 64   ;;  %s720_s28 = smov 4  }
   0xe   :  { %37 = dma.hbm_to_vmem [thread:$0]  %s842_s1, 1024, %s32_s25, [#allocation6], %s719_s27, %s719_s27, %s720_s28  }
   0xf   :  { %s721_s8 = smov [#allocation2]   ;;  %s722_s10 = smov [#allocation7]  }
  0x10   :  { %s22_s9 = sshll.u32 %s721_s8, 4  ;;  %s45_s11 = sshll.u32 %s722_s10, 4  ;;  %s23_s9 = int_to_ptr.vmem [resolvable:$true] %s22_s9  ;;  %s46_s11 = int_to_ptr.vmem [resolvable:$true] %s45_s11 }
  0x11   :  { %s638_s12 = scalar_lea.vmem %s23_s9, 128  ;;  %p643_p6 = scmp.lt.s32.totalorder %s23_s9, %s23_s9 }
  0x12   :  { %p639_p5 = scmp.ne.s32.totalorder %s23_s9, %s638_s12  ;;  %p644_p7 = scmp.lt.s32.totalorder %s638_s12, %s638_s12 }
  0x14   :  { %p645_p8 = por %p644_p7, %p643_p6 }
  0x16   :  { %p646_p9 = pnand %p645_p8, %p639_p5 }
  0x18   :  { %649 = shalt.err (!%p646_p9)
}
  0x19   :  { %25 = dma.hbm_to_vmem [thread:$0]  %s841_s0, 128, %s23_s9, [#allocation3]  }
  0x1a   :  { %s658_s15 = scalar_lea.vmem %s46_s11, 1024  ;;  %p663_p11 = scmp.lt.s32.totalorder %s46_s11, %s46_s11 }
  0x1b   :  { %p659_p10 = scmp.ne.s32.totalorder %s46_s11, %s658_s15  ;;  %p664_p12 = scmp.lt.s32.totalorder %s658_s15, %s658_s15 }
  0x1d   :  { %p665_p13 = por %p664_p12, %p663_p11 }
  0x1f   :  { %p666_p0 = pnand %p665_p13, %p659_p10 }
  0x21   :  { %669 = shalt.err (!%p666_p0)
}
  0x22   :  { %51 = dma.hbm_to_vmem [thread:$0]  %s844_s3, 1024, %s46_s11, [#allocation6], %s719_s27, %s719_s27, %s720_s28  }
  0x23   :  { %s723_s17 = smov [#allocation8]  }
  0x24   :  { %s59_s18 = sshll.u32 %s723_s17, 4  ;;  %s60_s18 = int_to_ptr.vmem [resolvable:$true] %s59_s18 }
  0x25   :  { %s678_s19 = scalar_lea.vmem %s60_s18, 1024  ;;  %p683_p2 = scmp.lt.s32.totalorder %s60_s18, %s60_s18 }
  0x26   :  { %p679_p1 = scmp.ne.s32.totalorder %s60_s18, %s678_s19  ;;  %p684_p3 = scmp.lt.s32.totalorder %s678_s19, %s678_s19 }
  0x28   :  { %p685_p4 = por %p684_p3, %p683_p2 }
  0x2a   :  { %p686_p5 = pnand %p685_p4, %p679_p1 }
  0x2c   :  { %689 = shalt.err (!%p686_p5)
}
  0x2d   :  { %65 = dma.hbm_to_vmem [thread:$0]  %s846_s5, 1024, %s60_s18, [#allocation9], %s719_s27, %s719_s27, %s720_s28  }
  0x2e   :  { %710 = dma.done.wait [#allocation3], 128  }
  0x2f   :  { %711 = vsyncadd [#allocation3], 4294967168 }
  0x30   :  { %712 = dma.done.wait [#allocation6], 2048  }
  0x31   :  { %713 = vsyncadd [#allocation6], 4294965248 }
  0x32   :  { %714 = dma.done.wait [#allocation9], 1024  }
  0x33   :  { %715 = vsyncadd [#allocation9], 4294966272  ;;  %v724_v0 = vmov 0.0   ;;  %v791_v1 = vld [vmem:[#allocation2] sm:$0xff]  ;;  %s725_s3 = smov 96   ;;  %v587_v3 = vld [vmem:[#allocation5 + $0x30] sm:$0xff]  }
  0x34   :  { %516 = vmatprep.subr.bf16.mxu0 %v724_v0  ;;  %536 = vmatprep.subr.bf16.mxu1 %v724_v0  ;;  %v586_v2 = vld [vmem:[#allocation5 + $0x38] sm:$0xff]   ;;  %v588_v4 = vld [vmem:[#allocation5 + $0x28] sm:$0xff]   ;;  %v589_v5 = vld [vmem:[#allocation5 + $0x20] sm:$0xff]   ;;  %vm726_vm0 = vmmov 0   ;;  %v89_v22 = vpack.c.bf16 %v791_v1, %v791_v1  ;;  %vm99_vm1 = vcmask 523264   ;;  %vm102_vm2 = vcmask 785408  }
  0x35   :  { %83 = vrot.lane.b32.xlu0 %v791_v1, %s725_s3  ;;  %517 = vmatpush3.bf16.msra.mxu0 %v586_v2  ;;  %v590_v6 = vld [vmem:[#allocation5 + $0x18] sm:$0xff]   ;;  %v591_v7 = vld [vmem:[#allocation5 + $0x10] sm:$0xff]   ;;  %v592_v8 = vld [vmem:[#allocation5 + $0x8] sm:$0xff]   ;;  %s727_s25 = smov [#allocation10]   ;;  %vm443_vm3 = vcmask 64512  }
  0x36   :  { %518 = vmatprep.subr.bf16.mxu0 %v724_v0  ;;  %v593_v9 = vld [vmem:[#allocation5] sm:$0xff]   ;;  %532 = vmatprep.mubr.msk.bf16.mxu0 %vm726_vm0, %v724_v0  ;;  %v594_v10 = vld [vmem:[#allocation7 + $0x38] sm:$0xff]   ;;  %v595_v11 = vld [vmem:[#allocation7 + $0x30] sm:$0xff]   ;;  %s451_s26 = sshll.u32 %s727_s25, 4  ;;  %s452_s26 = int_to_ptr.vmem [resolvable:$true] %s451_s26 }
  0x37   :  { %552 = vmatprep.mubr.msk.bf16.mxu1 %vm726_vm0, %v724_v0  ;;  %537 = vmatpush3.bf16.msra.mxu1 %v594_v10  ;;  %v596_v15 = vld [vmem:[#allocation7 + $0x28] sm:$0xff]   ;;  %v597_v19 = vld [vmem:[#allocation7 + $0x20] sm:$0xff]   ;;  %v598_v20 = vld [vmem:[#allocation7 + $0x18] sm:$0xff]   ;;  %p695_p7 = scmp.lt.s32.totalorder %s452_s26, %s452_s26 }
  0x38   :  { %538 = vmatprep.subr.bf16.mxu1 %v724_v0  ;;  %v599_v21 = vld [vmem:[#allocation7 + $0x10] sm:$0xff]   ;;  %v600_v27 = vld [vmem:[#allocation7 + $0x8] sm:$0xff]   ;;  %v601_v28 = vld [vmem:[#allocation7] sm:$0xff]  }
  0x39   :  { %519 = vmatpush3.bf16.msra.mxu0 %v587_v3  ;;  %v602_v29 = vld [vmem:[#allocation8 + $0x38] sm:$0xff]   ;;  %v603_v30 = vld [vmem:[#allocation8 + $0x30] sm:$0xff]   ;;  %v604_v31 = vld [vmem:[#allocation8 + $0x28] sm:$0xff]  }
  0x3a   :  { %520 = vmatprep.subr.bf16.mxu0 %v724_v0  ;;  %v605_v32 = vld [vmem:[#allocation8 + $0x20] sm:$0xff]   ;;  %v606_v33 = vld [vmem:[#allocation8 + $0x18] sm:$0xff]   ;;  %v607_v34 = vld [vmem:[#allocation8 + $0x10] sm:$0xff]  }
  0x3b   :  { %539 = vmatpush3.bf16.msra.mxu1 %v595_v11  ;;  %v462_v35 = vld [vmem:[%s843_s2] ss:$0 sm:$0xff]  ;;  %v608_v43 = vld [vmem:[#allocation8 + $0x8] sm:$0xff]   ;;  %v609_v44 = vld [vmem:[#allocation8] sm:$0xff]  }
  0x3c   :  { %540 = vmatprep.subr.bf16.mxu1 %v724_v0  ;;  %v471_v45 = vld [vmem:[%s845_s4] ss:$0 sm:$0xff]  ;;  %s690_s4 = scalar_lea.vmem %s452_s26, 128 }
  0x3d   :  { %521 = vmatpush3.bf16.msra.mxu0 %v588_v4  ;;  %v480_v53 = vld [vmem:[%s847_s6] ss:$0 sm:$0xff]  ;;  %p691_p6 = scmp.ne.s32.totalorder %s452_s26, %s690_s4  ;;  %p696_p8 = scmp.lt.s32.totalorder %s690_s4, %s690_s4 }
  0x3e   :  { %522 = vmatprep.subr.bf16.mxu0 %v724_v0 }
  0x3f   :  { %541 = vmatpush3.bf16.msra.mxu1 %v596_v15  ;;  %p697_p9 = por %p696_p8, %p695_p7 }
  0x40   :  { %542 = vmatprep.subr.bf16.mxu1 %v724_v0 }
  0x41   :  { %523 = vmatpush3.bf16.msra.mxu0 %v589_v5  ;;  %p698_p10 = pnand %p697_p9, %p691_p6 }
  0x42   :  { %524 = vmatprep.subr.bf16.mxu0 %v724_v0 }
  0x43   :  { %543 = vmatpush3.bf16.msra.mxu1 %v597_v19 }
  0x44   :  { %544 = vmatprep.subr.bf16.mxu1 %v724_v0 }
  0x45   :  { %525 = vmatpush3.bf16.msra.mxu0 %v590_v6 }
  0x46   :  { %526 = vmatprep.subr.bf16.mxu0 %v724_v0 }
  0x47   :  { %545 = vmatpush3.bf16.msra.mxu1 %v598_v20 }
  0x48   :  { %546 = vmatprep.subr.bf16.mxu1 %v724_v0 }
  0x49   :  { %527 = vmatpush3.bf16.msra.mxu0 %v591_v7 }
  0x4a   :  { %528 = vmatprep.subr.bf16.mxu0 %v724_v0 }
  0x4b   :  { %547 = vmatpush3.bf16.msra.mxu1 %v599_v21 }
  0x4c   :  { %548 = vmatprep.subr.bf16.mxu1 %v724_v0 }
  0x4d   :  { %529 = vmatpush3.bf16.msra.mxu0 %v592_v8 }
  0x4e   :  { %530 = vmatprep.subr.bf16.mxu0 %v724_v0 }
  0x4f   :  { %549 = vmatpush3.bf16.msra.mxu1 %v600_v27 }
  0x50   :  { %550 = vmatprep.subr.bf16.mxu1 %v724_v0 }
  0x51   :  { %531 = vmatpush3.bf16.msra.mxu0 %v593_v9 }
  0x52   :  { %556 = vmatprep.subr.bf16.mxu0 %v724_v0 }
  0x53   :  { %551 = vmatpush3.bf16.msra.mxu1 %v601_v28 }
  0xa7   :  { %v84_v12 = vpop.permute.xlu0 %83 }
  0xa8   :  { %v86_v13 = vsub.f32 %v791_v1, %v84_v12  ;;  %v88_v14 = vmul.f32 %v84_v12, %v791_v1 }
  0xaa   :  { %v91_v16 = vpack.c.bf16 %v88_v14, %v88_v14  ;;  %v87_v17 = vand.u32 2147483647, %v86_v13 }
  0xac   :  { %96 = vrot.lane.b32.xlu1 %v91_v16, %s725_s3  ;;  %v90_v18 = vpack.c.bf16 %v87_v17, %v87_v17 }
  0xae   :  { %93 = vrot.lane.b32.xlu0 %v90_v18, %s719_s27 }
 0x11e   :  { %v97_v24 = vpop.permute.xlu1 %96 }
 0x120   :  { %v94_v23 = vpop.permute.xlu0 %93 }
 0x121   :  { %v101_v25 = vsel %vm99_vm1, %v89_v22, %v94_v23 }
 0x122   :  { %v104_v26 = vsel %vm102_vm2, %v101_v25, %v97_v24 }
 0x123   :  { %533 = vmatmul.mubr.bf16.vlgmr.msra.gmra.mxu0 %v104_v26 }
 0x124   :  { %572 = vmatprep.mubr.msk.bf16.mxu0 %vm726_vm0, %v724_v0  ;;  %557 = vmatpush3.bf16.msra.mxu0 %v602_v29 }
 0x125   :  { %558 = vmatprep.subr.bf16.mxu0 %v724_v0 }
 0x128   :  { %559 = vmatpush3.bf16.msra.mxu0 %v603_v30 }
 0x129   :  { %560 = vmatprep.subr.bf16.mxu0 %v724_v0 }
 0x12c   :  { %561 = vmatpush3.bf16.msra.mxu0 %v604_v31 }
 0x12d   :  { %562 = vmatprep.subr.bf16.mxu0 %v724_v0 }
 0x130   :  { %563 = vmatpush3.bf16.msra.mxu0 %v605_v32 }
 0x131   :  { %564 = vmatprep.subr.bf16.mxu0 %v724_v0 }
 0x134   :  { %565 = vmatpush3.bf16.msra.mxu0 %v606_v33 }
 0x135   :  { %566 = vmatprep.subr.bf16.mxu0 %v724_v0 }
 0x138   :  { %567 = vmatpush3.bf16.msra.mxu0 %v607_v34 }
 0x139   :  { %568 = vmatprep.subr.bf16.mxu0 %v724_v0 }
 0x13c   :  { %569 = vmatpush3.bf16.msra.mxu0 %v608_v43 }
 0x13d   :  { %570 = vmatprep.subr.bf16.mxu0 %v724_v0 }
 0x140   :  { %571 = vmatpush3.bf16.msra.mxu0 %v609_v44 }
 0x1e3   :  { %v211_v36 = vpop.f32.mrf.mxu0 }
 0x1e4   :  { %v212_v37 = vadd.f32 %v462_v35, %v211_v36 }
 0x1e5   :  { %v534_v38 = vpop.f32.mrf.mxu0 }
 0x1e6   :  { %v217_v39 = vmax.f32 %v212_v37, 0.0 }
 0x1e7   :  { %v214_v40 = vpop.f32.mrf.mxu0 }
 0x1e8   :  { %v218_v41 = vpack.c.bf16 %v217_v39, %v217_v39 }
 0x1e9   :  { %v535_v42 = vpop.f32.mrf.mxu0 }
 0x1ea   :  { %553 = vmatmul.mubr.bf16.vlgmr.msra.gmra.mxu1 %v218_v41 }
 0x2aa   :  { %v324_v46 = vpop.f32.mrf.mxu1 }
 0x2ab   :  { %v325_v47 = vadd.f32 %v471_v45, %v324_v46 }
 0x2ac   :  { %v554_v48 = vpop.f32.mrf.mxu1 }
 0x2ad   :  { %v330_v49 = vmax.f32 %v325_v47, 0.0 }
 0x2ae   :  { %v327_v50 = vpop.f32.mrf.mxu1 }
 0x2af   :  { %v331_v51 = vpack.c.bf16 %v330_v49, %v330_v49 }
 0x2b0   :  { %v555_v52 = vpop.f32.mrf.mxu1 }
 0x2b1   :  { %573 = vmatmul.mubr.bf16.vlgmr.msra.gmra.mxu0 %v331_v51 }
 0x371   :  { %v437_v54 = vpop.f32.mrf.mxu0 }
 0x372   :  { %v438_v55 = vadd.f32 %v480_v53, %v437_v54 }
 0x373   :  { %v574_v56 = vpop.f32.mrf.mxu0 }
 0x374   :  { %444 = vst.msk [vmem:[#allocation10] sm:$0xff] %vm443_vm3, %v438_v55 }
 0x375   :  { %v440_v57 = vpop.f32.mrf.mxu0 }
 0x376   :  { %701 = shalt.err (!%p698_p10)
}
 0x377   :  { %454 = dma.vmem_to_hbm [thread:$0]  %s452_s26, 128, %s848_s7, [#allocation4]   ;;  %v575_v58 = vpop.f32.mrf.mxu0 }
 0x378   :  { %716 = dma.done.wait [#allocation4], 128  }
 0x379   :  { %717 = vsyncadd [#allocation4], 4294967168 }
 0x37a   :  { %458 = vsyncpa [#allocation3], 1 }
 0x37b   :  { %459 = vsyncpa [#allocation6], 1 }
 0x37c   :  { %460 = vsyncpa [#allocation9], 1 }
 0x37d   :  { %461 = vsyncpa [#allocation4], 1 }

</bundles_post_ra>
